<compile_context>
chip_gen: v6e
topology: v6e:2x2x1
jax: 0.10.0
libtpu: 0.0.40
codegen_flags: <defaults>
</compile_context>

<pallas_src>
import functools

import jax
import jax.numpy as jnp
from jax import lax
from jax.experimental import pallas as pl
from jax.experimental.pallas import tpu as pltpu


def _round_up(x, m):
    return (x + m - 1) // m * m


def _bcl_kernel(dist_ref, label_ref, out_ref, *, margin, num_channels,
                tile_rows, n_valid, needs_mask):
    # dist_ref / label_ref : (1, C, tile_rows, 128) blocks in VMEM.
    # out_ref              : (1, 4, 8, 128) f32 partial sums
    #                        [pos_count, neg_count, loss1_num, loss2_num],
    #                        resident across the row-tile (arbitrary) axis.
    j = pl.program_id(1)

    @pl.when(j == 0)
    def _():
        out_ref[...] = jnp.zeros_like(out_ref)

    d = dist_ref[0]      # (C, tile_rows, 128)
    l = label_ref[0]     # (C, tile_rows, 128)
    c = num_channels

    # First-occurrence argmax over the (small) leading channel axis.  The
    # channel axis maps to separate vreg slabs, so this is elementwise VPU
    # compare/select work on dense (tile_rows, 128) tiles.
    c_iota = lax.broadcasted_iota(jnp.int32, d.shape, 0)
    d_max = jnp.max(d, axis=0)
    d_arg = jnp.min(jnp.where(d == d_max[None, :, :], c_iota, c), axis=0)
    l_max = jnp.max(l, axis=0)
    l_arg = jnp.min(jnp.where(l == l_max[None, :, :], c_iota, c), axis=0)

    # label_modified: index 1 -> -1, index 0 -> +1, others unchanged.
    lab_mod = jnp.where(l_arg == 1, -1, l_arg)
    lab_mod = jnp.where(l_arg == 0, 1, lab_mod)
    lab_mod_f = lab_mod.astype(jnp.float32)

    dist = d_arg.astype(jnp.float32)
    if num_channels > 255:
        # The (label_index != 255) ignore path of the reference can only
        # trigger when the channel argmax can actually produce 255.
        dist = dist * (l_arg != 255).astype(jnp.float32)

    pos = (lab_mod == 1).astype(jnp.float32)
    neg = (lab_mod == -1).astype(jnp.float32)
    l1 = (1.0 + lab_mod_f) * 0.5 * dist * dist
    clamped = jnp.maximum(margin - dist, 0.0)
    l2 = (1.0 - lab_mod_f) * 0.5 * clamped * clamped

    if needs_mask:
        # Only emitted when the flattened spatial dim had to be padded.
        row_i = lax.broadcasted_iota(jnp.int32, (tile_rows, 128), 0)
        lane_i = lax.broadcasted_iota(jnp.int32, (tile_rows, 128), 1)
        pix = (j * tile_rows + row_i) * 128 + lane_i
        valid = (pix < n_valid).astype(jnp.float32)
        pos = pos * valid
        neg = neg * valid
        l1 = l1 * valid
        l2 = l2 * valid

    def red(x):
        # (tile_rows, 128) -> (8, 128): leading-axis adds only (VPU), the
        # reshape does not cross (8, 128) tile boundaries.
        return jnp.sum(x.reshape(tile_rows // 8, 8, 128), axis=0)

    out_ref[0, 0, :, :] += red(pos)
    out_ref[0, 1, :, :] += red(neg)
    out_ref[0, 2, :, :] += red(l1)
    out_ref[0, 3, :, :] += red(l2)


def bcl_loss(distance, label, margin=2.0, target_step_bytes=8 * 1024 * 1024):
    """Pallas implementation of BCL.forward(distance, label) for NCHW inputs."""
    B, C, H, W = distance.shape
    assert label.shape == (B, C, H, W)
    hw = H * W

    d_isz = jnp.dtype(distance.dtype).itemsize
    l_isz = jnp.dtype(label.dtype).itemsize

    rows = pl.cdiv(hw, 128)
    rows32 = _round_up(rows, 32)
    # Row tiles sized so each grid step streams ~target_step_bytes of input,
    # capped so (2 inputs x 2 pipeline buffers x block) fits the default
    # scoped-VMEM limit on all of v5e / v6e / v7x.
    max_tile_rows = max(
        32, (target_step_bytes // (C * 128 * (d_isz + l_isz))) // 32 * 32
    )
    n_tiles = pl.cdiv(rows32, max_tile_rows)
    tile_rows = _round_up(pl.cdiv(rows32, n_tiles), 32)
    rows_pad = n_tiles * tile_rows
    n_pad = rows_pad * 128

    # Free reshapes; a pad copy only happens when HW is not already tileable.
    d3 = distance.reshape(B, C, hw)
    l3 = label.reshape(B, C, hw)
    needs_mask = n_pad != hw
    if needs_mask:
        pad = ((0, 0), (0, 0), (0, n_pad - hw))
        d3 = jnp.pad(d3, pad)
        l3 = jnp.pad(l3, pad)
    d4 = d3.reshape(B, C, rows_pad, 128)
    l4 = l3.reshape(B, C, rows_pad, 128)

    kernel = functools.partial(
        _bcl_kernel,
        margin=float(margin),
        num_channels=C,
        tile_rows=tile_rows,
        n_valid=hw,
        needs_mask=needs_mask,
    )

    cost = pl.CostEstimate(
        flops=int(B * rows_pad * 128 * 24),
        transcendentals=0,
        bytes_accessed=int(B * C * n_pad * (d_isz + l_isz) + B * 4 * 8 * 128 * 4),
    )

    partials = pl.pallas_call(
        kernel,
        out_shape=jax.ShapeDtypeStruct((B, 4, 8, 128), jnp.float32),
        grid_spec=pltpu.PrefetchScalarGridSpec(
            num_scalar_prefetch=0,
            grid=(B, n_tiles),
            in_specs=[
                pl.BlockSpec((1, C, tile_rows, 128), lambda b, j: (b, 0, j, 0)),
                pl.BlockSpec((1, C, tile_rows, 128), lambda b, j: (b, 0, j, 0)),
            ],
            out_specs=pl.BlockSpec((1, 4, 8, 128), lambda b, j: (b, 0, 0, 0)),
        ),
        compiler_params=pltpu.CompilerParams(
            dimension_semantics=("parallel", "arbitrary"),
        ),
        cost_estimate=cost,
    )(d4, l4)

    # Tiny final reduction + scalar glue in plain JAX.
    sums = jnp.sum(partials, axis=(0, 2, 3))  # [pos, neg, loss1_num, loss2_num]
    pos_num = sums[0] + 0.0001
    neg_num = sums[1] + 0.0001
    return sums[2] / pos_num + sums[3] / neg_num


def bcl_ref(distance, label, margin=2.0):
    """Pure-JAX reference (mirrors the PyTorch module exactly)."""
    lab = jnp.argmax(label, axis=1)
    lab_mod = jnp.where(lab == 1, -1, lab)
    lab_mod = jnp.where(lab == 0, 1, lab_mod)
    mask = (lab != 255).astype(jnp.float32)
    dist = jnp.argmax(distance, axis=1).astype(jnp.float32) * mask
    pos_num = jnp.sum((lab_mod == 1).astype(jnp.float32)) + 0.0001
    neg_num = jnp.sum((lab_mod == -1).astype(jnp.float32)) + 0.0001
    loss_1 = jnp.sum((1 + lab_mod) / 2 * dist**2) / pos_num
    loss_2 = (
        jnp.sum((1 - lab_mod) / 2 * jnp.maximum(margin - dist, 0.0) ** 2) / neg_num
    )
    return loss_1 + loss_2


if __name__ == "__main__":
    key = jax.random.PRNGKey(0)
    k1, k2 = jax.random.split(key)

    B, C, H, W = 2, 2, 16, 16
    distance = jax.random.normal(k1, (B, C, H, W), dtype=jnp.float32)
    lab_idx = jax.random.randint(k2, (B, H, W), 0, C)
    label = jax.nn.one_hot(lab_idx, C, axis=1, dtype=jnp.float32)  # NCHW one-hot

    loss = bcl_loss(distance, label, margin=2.0)
    jax.block_until_ready(loss)

    ref = bcl_ref(distance, label, margin=2.0)
    assert jnp.allclose(loss, ref, rtol=1e-5, atol=1e-5), (loss, ref)

    print("KERNEL_OK")
</pallas_src>

<mosaic_0001>
module attributes {stable_mosaic.version = 11 : i64} {
  func.func @_bcl_kernel(%arg0: i32, %arg1: i32, %arg2: memref<1x2x32x128xf32, #tpu.memory_space<vmem>>, %arg3: memref<1x2x32x128xf32, #tpu.memory_space<vmem>>, %arg4: memref<1x4x8x128xf32, #tpu.memory_space<vmem>>) attributes {dimension_semantics = [#tpu.dimension_semantics<parallel>, #tpu.dimension_semantics<arbitrary>], iteration_bounds = array<i64: 2, 1>, scalar_prefetch = 0 : i64, scratch_operands = 0 : i64, tpu.core_type = #tpu.core_type<tc>, window_params = [{transform_indices = @transform_0, window_bounds = array<i64: 1, 2, 32, 128>}, {transform_indices = @transform_1, window_bounds = array<i64: 1, 2, 32, 128>}, {transform_indices = @transform_2, window_bounds = array<i64: 1, 4, 8, 128>}]} {
    %c0_i32 = arith.constant 0 : i32
    %0 = arith.cmpi eq, %arg1, %c0_i32 : i32
    %1 = arith.extui %0 : i1 to i32
    %c0_i32_0 = arith.constant 0 : i32
    %2 = arith.cmpi ne, %1, %c0_i32_0 : i32
    scf.if %2 {
      %cst_55 = arith.constant 0.000000e+00 : f32
      %104 = vector.broadcast %cst_55 : f32 to vector<1x4x8x128xf32>
      %c0_56 = arith.constant 0 : index
      %c0_57 = arith.constant 0 : index
      %c0_58 = arith.constant 0 : index
      %c0_59 = arith.constant 0 : index
      %105 = vector.load %arg4[%c0_56, %c0_57, %c0_58, %c0_59] : memref<1x4x8x128xf32, #tpu.memory_space<vmem>>, vector<1x4x8x128xf32>
      tpu.vector_store %arg4[%c0_56, %c0_57, %c0_58, %c0_59], %104 {strides = array<i32>} : memref<1x4x8x128xf32, #tpu.memory_space<vmem>>, vector<1x4x8x128xf32>,
    } else {
    }
    %c0 = arith.constant 0 : index
    %c0_1 = arith.constant 0 : index
    %c0_2 = arith.constant 0 : index
    %c0_3 = arith.constant 0 : index
    %3 = vector.load %arg2[%c0, %c0_1, %c0_2, %c0_3] : memref<1x2x32x128xf32, #tpu.memory_space<vmem>>, vector<1x2x32x128xf32>
    %4 = vector.shape_cast %3 : vector<1x2x32x128xf32> to vector<2x32x128xf32>
    %c0_4 = arith.constant 0 : index
    %c0_5 = arith.constant 0 : index
    %c0_6 = arith.constant 0 : index
    %c0_7 = arith.constant 0 : index
    %5 = vector.load %arg3[%c0_4, %c0_5, %c0_6, %c0_7] : memref<1x2x32x128xf32, #tpu.memory_space<vmem>>, vector<1x2x32x128xf32>
    %6 = vector.shape_cast %5 : vector<1x2x32x128xf32> to vector<2x32x128xf32>
    %7 = tpu.iota {dimensions = array<i32: 0>} : vector<2x32x128xi32>
    %cst = arith.constant dense<0xFF800000> : vector<32x128xf32>
    %8 = vector.multi_reduction <maximumf>, %4, %cst [0] : vector<2x32x128xf32> to vector<32x128xf32>
    %9 = vector.shape_cast %8 : vector<32x128xf32> to vector<1x32x128xf32>
    %10 = vector.broadcast %9 : vector<1x32x128xf32> to vector<2x32x128xf32>
    %11 = arith.cmpf oeq, %4, %10 : vector<2x32x128xf32>
    %c2_i32 = arith.constant 2 : i32
    %12 = vector.broadcast %c2_i32 : i32 to vector<2x32x128xi32>
    %13 = arith.select %11, %7, %12 : vector<2x32x128xi1>, vector<2x32x128xi32>
    %cst_8 = arith.constant dense<2147483647> : vector<32x128xi32>
    %14 = vector.multi_reduction <minsi>, %13, %cst_8 [0] : vector<2x32x128xi32> to vector<32x128xi32>
    %cst_9 = arith.constant dense<0xFF800000> : vector<32x128xf32>
    %15 = vector.multi_reduction <maximumf>, %6, %cst_9 [0] : vector<2x32x128xf32> to vector<32x128xf32>
    %16 = vector.shape_cast %15 : vector<32x128xf32> to vector<1x32x128xf32>
    %17 = vector.broadcast %16 : vector<1x32x128xf32> to vector<2x32x128xf32>
    %18 = arith.cmpf oeq, %6, %17 : vector<2x32x128xf32>
    %c2_i32_10 = arith.constant 2 : i32
    %19 = vector.broadcast %c2_i32_10 : i32 to vector<2x32x128xi32>
    %20 = arith.select %18, %7, %19 : vector<2x32x128xi1>, vector<2x32x128xi32>
    %cst_11 = arith.constant dense<2147483647> : vector<32x128xi32>
    %21 = vector.multi_reduction <minsi>, %20, %cst_11 [0] : vector<2x32x128xi32> to vector<32x128xi32>
    %c1_i32 = arith.constant 1 : i32
    %22 = vector.broadcast %c1_i32 : i32 to vector<32x128xi32>
    %23 = arith.cmpi eq, %21, %22 : vector<32x128xi32>
    %c-1_i32 = arith.constant -1 : i32
    %24 = vector.broadcast %c-1_i32 : i32 to vector<32x128xi32>
    %25 = arith.select %23, %24, %21 : vector<32x128xi1>, vector<32x128xi32>
    %c0_i32_12 = arith.constant 0 : i32
    %26 = vector.broadcast %c0_i32_12 : i32 to vector<32x128xi32>
    %27 = arith.cmpi eq, %21, %26 : vector<32x128xi32>
    %c1_i32_13 = arith.constant 1 : i32
    %28 = vector.broadcast %c1_i32_13 : i32 to vector<32x128xi32>
    %29 = arith.select %27, %28, %25 : vector<32x128xi1>, vector<32x128xi32>
    %30 = arith.sitofp %29 : vector<32x128xi32> to vector<32x128xf32>
    %31 = arith.sitofp %14 : vector<32x128xi32> to vector<32x128xf32>
    %c1_i32_14 = arith.constant 1 : i32
    %32 = vector.broadcast %c1_i32_14 : i32 to vector<32x128xi32>
    %33 = arith.cmpi eq, %29, %32 : vector<32x128xi32>
    %34 = arith.extui %33 : vector<32x128xi1> to vector<32x128xi32>
    %35 = arith.sitofp %34 : vector<32x128xi32> to vector<32x128xf32>
    %c-1_i32_15 = arith.constant -1 : i32
    %36 = vector.broadcast %c-1_i32_15 : i32 to vector<32x128xi32>
    %37 = arith.cmpi eq, %29, %36 : vector<32x128xi32>
    %38 = arith.extui %37 : vector<32x128xi1> to vector<32x128xi32>
    %39 = arith.sitofp %38 : vector<32x128xi32> to vector<32x128xf32>
    %cst_16 = arith.constant 1.000000e+00 : f32
    %40 = vector.broadcast %cst_16 : f32 to vector<32x128xf32>
    %41 = arith.addf %40, %30 : vector<32x128xf32>
    %cst_17 = arith.constant 5.000000e-01 : f32
    %42 = vector.broadcast %cst_17 : f32 to vector<32x128xf32>
    %43 = arith.mulf %41, %42 : vector<32x128xf32>
    %44 = arith.mulf %43, %31 : vector<32x128xf32>
    %45 = arith.mulf %44, %31 : vector<32x128xf32>
    %cst_18 = arith.constant 2.000000e+00 : f32
    %46 = vector.broadcast %cst_18 : f32 to vector<32x128xf32>
    %47 = arith.subf %46, %31 : vector<32x128xf32>
    %cst_19 = arith.constant 0.000000e+00 : f32
    %48 = vector.broadcast %cst_19 : f32 to vector<32x128xf32>
    %49 = arith.maximumf %47, %48 : vector<32x128xf32>
    %cst_20 = arith.constant 1.000000e+00 : f32
    %50 = vector.broadcast %cst_20 : f32 to vector<32x128xf32>
    %51 = arith.subf %50, %30 : vector<32x128xf32>
    %cst_21 = arith.constant 5.000000e-01 : f32
    %52 = vector.broadcast %cst_21 : f32 to vector<32x128xf32>
    %53 = arith.mulf %51, %52 : vector<32x128xf32>
    %54 = arith.mulf %53, %49 : vector<32x128xf32>
    %55 = arith.mulf %54, %49 : vector<32x128xf32>
    %56 = tpu.iota {dimensions = array<i32: 0>} : vector<32x128xi32>
    %57 = tpu.iota {dimensions = array<i32: 1>} : vector<32x128xi32>
    %c32_i32 = arith.constant 32 : i32
    %58 = arith.muli %arg1, %c32_i32 : i32
    %59 = vector.broadcast %58 : i32 to vector<32x128xi32>
    %60 = arith.addi %59, %56 : vector<32x128xi32>
    %c128_i32 = arith.constant 128 : i32
    %61 = vector.broadcast %c128_i32 : i32 to vector<32x128xi32>
    %62 = arith.muli %60, %61 : vector<32x128xi32>
    %63 = arith.addi %62, %57 : vector<32x128xi32>
    %c256_i32 = arith.constant 256 : i32
    %64 = vector.broadcast %c256_i32 : i32 to vector<32x128xi32>
    %65 = arith.cmpi slt, %63, %64 : vector<32x128xi32>
    %66 = arith.extui %65 : vector<32x128xi1> to vector<32x128xi32>
    %67 = arith.sitofp %66 : vector<32x128xi32> to vector<32x128xf32>
    %68 = arith.mulf %35, %67 : vector<32x128xf32>
    %69 = arith.mulf %39, %67 : vector<32x128xf32>
    %70 = arith.mulf %45, %67 : vector<32x128xf32>
    %71 = arith.mulf %55, %67 : vector<32x128xf32>
    %c0_22 = arith.constant 0 : index
    %c0_23 = arith.constant 0 : index
    %c0_24 = arith.constant 0 : index
    %c0_25 = arith.constant 0 : index
    %72 = vector.load %arg4[%c0_22, %c0_23, %c0_24, %c0_25] : memref<1x4x8x128xf32, #tpu.memory_space<vmem>>, vector<1x1x8x128xf32>
    %73 = vector.shape_cast %72 : vector<1x1x8x128xf32> to vector<8x128xf32>
    %74 = vector.shape_cast %68 : vector<32x128xf32> to vector<4x8x128xf32>
    %cst_26 = arith.constant dense<0.000000e+00> : vector<8x128xf32>
    %75 = vector.multi_reduction <add>, %74, %cst_26 [0] : vector<4x8x128xf32> to vector<8x128xf32>
    %76 = arith.addf %73, %75 : vector<8x128xf32>
    %c0_27 = arith.constant 0 : index
    %c0_28 = arith.constant 0 : index
    %c0_29 = arith.constant 0 : index
    %c0_30 = arith.constant 0 : index
    %77 = vector.load %arg4[%c0_27, %c0_28, %c0_29, %c0_30] : memref<1x4x8x128xf32, #tpu.memory_space<vmem>>, vector<1x1x8x128xf32>
    %78 = vector.shape_cast %77 : vector<1x1x8x128xf32> to vector<8x128xf32>
    %79 = vector.shape_cast %76 : vector<8x128xf32> to vector<1x1x8x128xf32>
    tpu.vector_store %arg4[%c0_27, %c0_28, %c0_29, %c0_30], %79 {strides = array<i32>} : memref<1x4x8x128xf32, #tpu.memory_space<vmem>>, vector<1x1x8x128xf32>,
    %c0_31 = arith.constant 0 : index
    %c1 = arith.constant 1 : index
    %c0_32 = arith.constant 0 : index
    %c0_33 = arith.constant 0 : index
    %80 = vector.load %arg4[%c0_31, %c1, %c0_32, %c0_33] : memref<1x4x8x128xf32, #tpu.memory_space<vmem>>, vector<1x1x8x128xf32>
    %81 = vector.shape_cast %80 : vector<1x1x8x128xf32> to vector<8x128xf32>
    %82 = vector.shape_cast %69 : vector<32x128xf32> to vector<4x8x128xf32>
    %cst_34 = arith.constant dense<0.000000e+00> : vector<8x128xf32>
    %83 = vector.multi_reduction <add>, %82, %cst_34 [0] : vector<4x8x128xf32> to vector<8x128xf32>
    %84 = arith.addf %81, %83 : vector<8x128xf32>
    %c0_35 = arith.constant 0 : index
    %c1_36 = arith.constant 1 : index
    %c0_37 = arith.constant 0 : index
    %c0_38 = arith.constant 0 : index
    %85 = vector.load %arg4[%c0_35, %c1_36, %c0_37, %c0_38] : memref<1x4x8x128xf32, #tpu.memory_space<vmem>>, vector<1x1x8x128xf32>
    %86 = vector.shape_cast %85 : vector<1x1x8x128xf32> to vector<8x128xf32>
    %87 = vector.shape_cast %84 : vector<8x128xf32> to vector<1x1x8x128xf32>
    tpu.vector_store %arg4[%c0_35, %c1_36, %c0_37, %c0_38], %87 {strides = array<i32>} : memref<1x4x8x128xf32, #tpu.memory_space<vmem>>, vector<1x1x8x128xf32>,
    %c0_39 = arith.constant 0 : index
    %c2 = arith.constant 2 : index
    %c0_40 = arith.constant 0 : index
    %c0_41 = arith.constant 0 : index
    %88 = vector.load %arg4[%c0_39, %c2, %c0_40, %c0_41] : memref<1x4x8x128xf32, #tpu.memory_space<vmem>>, vector<1x1x8x128xf32>
    %89 = vector.shape_cast %88 : vector<1x1x8x128xf32> to vector<8x128xf32>
    %90 = vector.shape_cast %70 : vector<32x128xf32> to vector<4x8x128xf32>
    %cst_42 = arith.constant dense<0.000000e+00> : vector<8x128xf32>
    %91 = vector.multi_reduction <add>, %90, %cst_42 [0] : vector<4x8x128xf32> to vector<8x128xf32>
    %92 = arith.addf %89, %91 : vector<8x128xf32>
    %c0_43 = arith.constant 0 : index
    %c2_44 = arith.constant 2 : index
    %c0_45 = arith.constant 0 : index
    %c0_46 = arith.constant 0 : index
    %93 = vector.load %arg4[%c0_43, %c2_44, %c0_45, %c0_46] : memref<1x4x8x128xf32, #tpu.memory_space<vmem>>, vector<1x1x8x128xf32>
    %94 = vector.shape_cast %93 : vector<1x1x8x128xf32> to vector<8x128xf32>
    %95 = vector.shape_cast %92 : vector<8x128xf32> to vector<1x1x8x128xf32>
    tpu.vector_store %arg4[%c0_43, %c2_44, %c0_45, %c0_46], %95 {strides = array<i32>} : memref<1x4x8x128xf32, #tpu.memory_space<vmem>>, vector<1x1x8x128xf32>,
    %c0_47 = arith.constant 0 : index
    %c3 = arith.constant 3 : index
    %c0_48 = arith.constant 0 : index
    %c0_49 = arith.constant 0 : index
    %96 = vector.load %arg4[%c0_47, %c3, %c0_48, %c0_49] : memref<1x4x8x128xf32, #tpu.memory_space<vmem>>, vector<1x1x8x128xf32>
    %97 = vector.shape_cast %96 : vector<1x1x8x128xf32> to vector<8x128xf32>
    %98 = vector.shape_cast %71 : vector<32x128xf32> to vector<4x8x128xf32>
    %cst_50 = arith.constant dense<0.000000e+00> : vector<8x128xf32>
    %99 = vector.multi_reduction <add>, %98, %cst_50 [0] : vector<4x8x128xf32> to vector<8x128xf32>
    %100 = arith.addf %97, %99 : vector<8x128xf32>
    %c0_51 = arith.constant 0 : index
    %c3_52 = arith.constant 3 : index
    %c0_53 = arith.constant 0 : index
    %c0_54 = arith.constant 0 : index
    %101 = vector.load %arg4[%c0_51, %c3_52, %c0_53, %c0_54] : memref<1x4x8x128xf32, #tpu.memory_space<vmem>>, vector<1x1x8x128xf32>
    %102 = vector.shape_cast %101 : vector<1x1x8x128xf32> to vector<8x128xf32>
    %103 = vector.shape_cast %100 : vector<8x128xf32> to vector<1x1x8x128xf32>
    tpu.vector_store %arg4[%c0_51, %c3_52, %c0_53, %c0_54], %103 {strides = array<i32>} : memref<1x4x8x128xf32, #tpu.memory_space<vmem>>, vector<1x1x8x128xf32>,
    return
  }
  func.func @transform_0(%arg0: i32, %arg1: i32) -> (i32, i32, i32, i32) {
    %c0_i32 = arith.constant 0 : i32
    %c0_i32_0 = arith.constant 0 : i32
    %c0_i32_1 = arith.constant 0 : i32
    return %arg0, %c0_i32, %arg1, %c0_i32_0 : i32, i32, i32, i32
  }
  func.func @transform_1(%arg0: i32, %arg1: i32) -> (i32, i32, i32, i32) {
    %c0_i32 = arith.constant 0 : i32
    %c0_i32_0 = arith.constant 0 : i32
    %c0_i32_1 = arith.constant 0 : i32
    return %arg0, %c0_i32, %arg1, %c0_i32_0 : i32, i32, i32, i32
  }
  func.func @transform_2(%arg0: i32, %arg1: i32) -> (i32, i32, i32, i32) {
    %c0_i32 = arith.constant 0 : i32
    %c0_i32_0 = arith.constant 0 : i32
    %c0_i32_1 = arith.constant 0 : i32
    %c0_i32_2 = arith.constant 0 : i32
    return %arg0, %c0_i32, %c0_i32_0, %c0_i32_1 : i32, i32, i32, i32
  }
}

</mosaic_0001>

<bundles_post_ra>
// kernel: tpu_custom_call.1
= control target key start
LH: loop header
LB: loop body
LE: loop exit
PB: predicated region body
PF: predicated region fallthrough
CT: control target
= control target key end

     0   :  { %7 = vsyncpa [#allocation3], 0  ;;  %s1171_s0 = inlined_call_operand.hbm [shape: f32[2,2,32,128], index: 0, kind: input, shape index: {}]   ;;  %s1172_s1 = inlined_call_operand.hbm [shape: f32[2,2,32,128], index: 1, kind: input, shape index: {}]   ;;  %s1173_s2 = inlined_call_operand.hbm [shape: f32[2,4,8,128], index: 2, kind: output, shape index: {}]  }
   0x1   :  { %9 = vsyncpa [#allocation3 + $0x1], 0 }
   0x2   :  { %10 = vsyncpa [#allocation6], 0 }
   0x3   :  { %12 = vsyncpa [#allocation6 + $0x1], 0 }
   0x4   :  { %13 = vsyncpa [#allocation4], 0 }
   0x5   :  { %15 = vsyncpa [#allocation4 + $0x1], 0  ;;  %s871_s9 = smov 0   ;;  %s873_s10 = smov 0  }
   0x6   :  { %s875_s11 = smov 0   ;;  %s877_s12 = smov 0  }
   0x7   :  { %s879_s13 = smov 0   ;;  %s881_s14 = smov 0  }
   0x8 LB: > { %s592_s15 = sadd.s32 4294967295, %s845_s14   ;;  %s593_s16 = sadd.s32 4294967294, %s845_s14   ;;  %s845_s14 = sphi %s881_s14, %s21_s14   ;;  %s841_s13 = sphi %s879_s13, %s1184_s13   ;;  %s837_s12 = sphi %s877_s12, %s1183_s12   ;;  %s833_s11 = sphi %s875_s11, %s1182_s11   ;;  %s829_s10 = sphi %s873_s10, %s1181_s10   ;;  %s825_s9 = sphi %s871_s9, %s1180_s9  }
   0x9   : > { %s33_s17 = sadd.s32 1, %s841_s13  ;;  %s42_s18 = sadd.s32 1, %s833_s11 }
   0xa   : > { %p35_p0 = scmp.ge.s32.totalorder %s33_s17, 2  ;;  %p49_p1 = scmp.ne.s32.totalorder %s833_s11, %s829_s10 }
   0xb   : > { %p50_p2 = scmp.eq.s32.totalorder %s845_s14, 0  ;;  %p55_p3 = scmp.ne.s32.totalorder %s829_s10, %s825_s9 }
   0xc   : > { %s1186_s17 = smov (%p35_p0, %s33_s17), 0  ;;  %p56_p5 = scmp.eq.s32.totalorder %s592_s15, 0 }
   0xd   : > { %p912_p4 = por %p50_p2, %p49_p1  ;;  %s37_s20 = ssub.s32 %s841_s13, %s1186_s17 }
   0xe   : > { %p107_p6 = scmp.eq.s32.totalorder %s592_s15, 1  ;;  %p40_p7 = scmp.eq.s32.totalorder %s37_s20, 0 }
   0xf   : > { %p918_p8 = por %p56_p5, %p55_p3  ;;  %p113_p10 = scmp.eq.s32.totalorder %s593_s16, 1 }
  0x10   : > { %p922_p9 = por %p107_p6, %p49_p1  ;;  %p595_p12 = scmp.ge.s32.totalorder %s845_s14, 2 }
  0x11   : > { %s927_s23 = scalar_select %p40_p7, %s833_s11, %s42_s18  }
  0x12   : > { %p929_p11 = por %p113_p10, %p55_p3  ;;  %p649_p13 = scmp.lt.s32.totalorder %s845_s14, 2 }
  0x13   : > { %s936_s25 = sand.u32 1, %s833_s11   ;;  %s629_s27 = sshll.u32 %s841_s13, 10 }
  0x14   : > { %s596_s26 = sshll.u32 %s936_s25, 6  ;;  %s145_s30 = scalar_lea.hbm %s1171_s0, %s629_s27 }
  0x15   : > { %s137_s3 = scalar_lea.vmem [#allocation2], %s596_s26  ;;  %p949_p0 = pnand %p649_p13, %p912_p4 }
  0x16   : > { %s146_s4 = sshll.u32 %s137_s3, 4  ;;  %p602_p1 = scmp.ge.s32.totalorder %s845_s14, 1  ;;  %s147_s4 = int_to_ptr.vmem [resolvable:$true] %s146_s4 }
  0x17   : > { %s134_s6 = scalar_lea.sflag [#allocation3], %s936_s25  ;;  %p707_p2 = pneg %p949_p0 }
  0x18   : > { %s718_s7 = scalar_lea.vmem %s147_s4, 1024  ;;  %s847_s8 = smov [#allocation2]  }
  0x19   : > { %p719_p3 = scmp.ne.s32.totalorder %s147_s4, %s718_s7  ;;  %s723_s15 = sshll.u32 %s847_s8, 4  ;;  %s724_s15 = int_to_ptr.vmem [resolvable:$false] %s723_s15 }
  0x1a   : > { %s725_s16 = scalar_lea.vmem %s724_s15, 2048  ;;  %p726_p4 = scmp.lt.s32.totalorder %s147_s4, %s724_s15 }
  0x1b   : > { %p721_p5 = pnand %p719_p3, %p707_p2  ;;  %p727_p7 = scmp.lt.s32.totalorder %s725_s16, %s718_s7 }
  0x1d   : > { %p722_p6 = pneg %p721_p5  ;;  %p728_p10 = por %p727_p7, %p726_p4 }
  0x1f   : > { %p729_p13 = pnand %p728_p10, %p722_p6 }
  0x21   : > { %732 = shalt.err (!%p729_p13)
}
  0x22   : > { %s848_s18 = smov 128   ;;  %s849_s19 = smov 8  }
  0x23   : > { %641 = dma.hbm_to_vmem [thread:$0]  (!%p949_p0), %s145_s30, 1024, %s147_s4, %s134_s6, %s848_s18, %s848_s18, %s849_s19  }
  0x24   : > { %p177_p3 = scmp.lt.s32.totalorder %s845_s14, 3  ;;  %s168_s29 = scalar_lea.hbm %s1172_s1, %s629_s27 }
  0x25   : > { %s160_s7 = scalar_lea.vmem [#allocation5], %s596_s26  ;;  %s157_s15 = scalar_lea.sflag [#allocation6], %s936_s25 }
  0x26   : > { %p970_p5 = pnand %p602_p1, %p177_p3  ;;  %s169_s8 = sshll.u32 %s160_s7, 4  ;;  %s170_s8 = int_to_ptr.vmem [resolvable:$true] %s169_s8 }
  0x27   : > { %s746_s16 = scalar_lea.vmem %s170_s8, 1024  ;;  %s850_s30 = smov [#allocation5]  }
  0x28   : > { %p747_p6 = scmp.ne.s32.totalorder %s170_s8, %s746_s16  ;;  %s751_s4 = sshll.u32 %s850_s30, 4  ;;  %s752_s4 = int_to_ptr.vmem [resolvable:$false] %s751_s4 }
  0x29   : > { %s753_s27 = scalar_lea.vmem %s752_s4, 2048  ;;  %p754_p10 = scmp.lt.s32.totalorder %s170_s8, %s752_s4 }
  0x2a   : > { %p749_p4 = pnand %p747_p6, %p707_p2  ;;  %p755_p1 = scmp.lt.s32.totalorder %s753_s27, %s746_s16 }
  0x2c   : > { %p750_p7 = pneg %p749_p4  ;;  %p756_p13 = por %p755_p1, %p754_p10 }
  0x2e   : > { %p757_p3 = pnand %p756_p13, %p750_p7 }
  0x30   : > { %760 = shalt.err (!%p757_p3)
}
  0x31   : > { %644 = dma.hbm_to_vmem [thread:$0]  (!%p949_p0), %s168_s29, 1024, %s170_s8, %s157_s15, %s848_s18, %s848_s18, %s849_s19  }
  0x32   : > { %181 = sbr.rel (%p970_p5) target bundleno = 128 (0x80), region = 28  ;;  %s985_s25 = sand.u32 (!%p970_p5), 1, %s829_s10  }
  0x33   : > { %s603_s26 = sshll.u32 (!%p970_p5), %s985_s25, 6  ;;  %s184_s6 = scalar_lea.sflag (!%p970_p5), [#allocation3], %s985_s25 }
  0x34   : > { %s989_s20 = scalar_lea.vmem (!%p970_p5), [#allocation2], %s603_s26 }
  0x37   : > { %812 = dma.done.wait (%p918_p8), %s184_s6, 1024  }
  0x38   : > { %814 = vsyncadd (%p918_p8), %s184_s6, 4294966272  ;;  %s193_s5 = scalar_lea.sflag [#allocation6], %s985_s25  ;;  %s196_s18 = scalar_lea.vmem [#allocation5], %s603_s26 }
  0x39   : > { %816 = dma.done.wait (%p918_p8), %s193_s5, 1024  }
  0x3a   : > { %818 = vsyncadd (%p918_p8), %s193_s5, 4294966272  ;;  %v392_v0 = vlaneseq  ;;  %v240_v10 = vld [vmem:[%s196_s18] sm:$0xff]  ;;  %v241_v11 = vld [vmem:[%s196_s18 + $0x8] sm:$0xff]  ;;  %v851_v26 = vmov 0.0   ;;  %v852_v28 = vmov 2   ;;  %s605_s21 = sshll.u32 %s985_s25, 5 }
  0x3b   : > { %v242_v12 = vld [vmem:[%s196_s18 + $0x10] sm:$0xff]  ;;  %v243_v14 = vld [vmem:[%s196_s18 + $0x18] sm:$0xff]  ;;  %v244_v15 = vld [vmem:[%s196_s18 + $0x20] sm:$0xff]  ;;  %s1084_s19 = scalar_lea.vmem [#allocation7], %s605_s21  ;;  %s631_s28 = sshll.u32 %s837_s12, 9 }
  0x3c   : > { %v393_v1 = vshrl.u32 %v392_v0, 7  ;;  %v398_v2 = vand.u32 127, %v392_v0  ;;  %v245_v16 = vld [vmem:[%s196_s18 + $0x28] sm:$0xff]  ;;  %v246_v17 = vld [vmem:[%s196_s18 + $0x30] sm:$0xff]  ;;  %v247_v18 = vld [vmem:[%s196_s18 + $0x38] sm:$0xff]  ;;  %v276_v19 = vmax.f32 %v240_v10, %v244_v15  ;;  %s482_s29 = sshll.u32 %s1084_s19, 4  ;;  %s1120_s8 = scalar_lea.hbm %s1173_s2, %s631_s28  ;;  %s1122_s29 = int_to_ptr.vmem [resolvable:$true] %s482_s29 }
  0x3d   : > { %v277_v20 = vmax.f32 %v241_v11, %v245_v16  ;;  %v278_v23 = vmax.f32 %v242_v12, %v246_v17  ;;  %v279_v24 = vmax.f32 %v243_v14, %v247_v18  ;;  %v232_v63 = vld [vmem:[%s989_s20] sm:$0xff]  ;;  %v233_v0 = vld [vmem:[%s989_s20 + $0x8] sm:$0xff]  ;;  %s469_s15 = scalar_lea.sflag [#allocation4], %s985_s25  ;;  %s761_s16 = scalar_lea.vmem %s1122_s29, 512 }
  0x3e   : > { %v394_v3 = vadd.s32 8, %v393_v1  ;;  %v395_v4 = vadd.s32 16, %v393_v1  ;;  %v396_v5 = vadd.s32 24, %v393_v1  ;;  %v405_v6 = vmul.u32 128, %v393_v1  ;;  %p762_p8 = scmp.ne.s32.totalorder %s1122_s29, %s761_s16  ;;  %s853_s12 = smov [#allocation7]  }
  0x3f   : > { %vm280_vm1 = vcmp.eq.f32.partialorder %v240_v10, %v276_v19  ;;  %vm281_vm2 = vcmp.eq.f32.partialorder %v241_v11, %v277_v20  ;;  %vm284_vm3 = vcmp.eq.f32.partialorder %v244_v15, %v276_v19  ;;  %vm285_vm4 = vcmp.eq.f32.partialorder %v245_v16, %v277_v20  ;;  %v238_v10 = vld [vmem:[%s989_s20 + $0x30] sm:$0xff]  ;;  %v239_v11 = vld [vmem:[%s989_s20 + $0x38] sm:$0xff]  ;;  %s765_s30 = sshll.u32 %s853_s12, 4  ;;  %s766_s30 = int_to_ptr.vmem [resolvable:$false] %s765_s30 }
  0x40   : > { %v406_v7 = vmul.u32 128, %v394_v3  ;;  %v407_v8 = vmul.u32 128, %v395_v4  ;;  %v409_v9 = vadd.s32 %v405_v6, %v398_v2  ;;  %vm282_vm5 = vcmp.eq.f32.partialorder %v242_v12, %v278_v23  ;;  %v236_v3 = vld [vmem:[%s989_s20 + $0x20] sm:$0xff]  ;;  %v237_v4 = vld [vmem:[%s989_s20 + $0x28] sm:$0xff]  ;;  %p763_p0 = pnand %p762_p8, %p922_p9  ;;  %s767_s4 = scalar_lea.vmem %s766_s30, 1024 }
  0x41   : > { %v408_v13 = vmul.u32 128, %v396_v5  ;;  %vm283_vm6 = vcmp.eq.f32.partialorder %v243_v14, %v279_v24  ;;  %vm286_vm7 = vcmp.eq.f32.partialorder %v246_v17, %v278_v23  ;;  %vm287_vm8 = vcmp.eq.f32.partialorder %v247_v18, %v279_v24  ;;  %p768_p5 = scmp.lt.s32.totalorder %s1122_s29, %s766_s30  ;;  %p769_p6 = scmp.lt.s32.totalorder %s767_s4, %s761_s16 }
  0x42   : > { %vm413_vm0 = vcmp.lt.s32.totalorder %v409_v9, 256  ;;  %v1000_v21 = vadd.s32 %v406_v7, %v398_v2  ;;  %v1002_v22 = vadd.s32 %v407_v8, %v398_v2  ;;  %v288_v29 = vsel %vm280_vm1, 0, %v852_v28  ;;  %v235_v9 = vld [vmem:[%s989_s20 + $0x18] sm:$0xff]  ;;  %p764_p2 = pneg %p763_p0 }
  0x43   : > { %v1004_v25 = vadd.s32 %v408_v13, %v398_v2  ;;  %v1007_v27 = vsel %vm413_vm0, 1.0, %v851_v26  ;;  %v289_v30 = vsel %vm281_vm2, 0, %v852_v28  ;;  %v290_v31 = vsel %vm282_vm5, 0, %v852_v28  ;;  %v234_v2 = vld [vmem:[%s989_s20 + $0x10] sm:$0xff]  ;;  %p770_p4 = por %p769_p6, %p768_p5 }
  0x44   : > { %v291_v32 = vsel %vm283_vm6, 0, %v852_v28  ;;  %vm414_vm9 = vcmp.lt.s32.totalorder %v1000_v21, 256  ;;  %vm415_vm10 = vcmp.lt.s32.totalorder %v1002_v22, 256  ;;  %v292_v33 = vsel %vm284_vm3, 1, %v852_v28 }
  0x45   : > { %v293_v34 = vsel %vm285_vm4, 1, %v852_v28  ;;  %v294_v35 = vsel %vm286_vm7, 1, %v852_v28  ;;  %v295_v36 = vsel %vm287_vm8, 1, %v852_v28  ;;  %vm296_vm11 = vcmp.lt.s32.totalorder %v288_v29, %v292_v33  ;;  %p771_p7 = pnand %p770_p4, %p764_p2 }
  0x46   : > { %vm298_vm12 = vcmp.lt.s32.totalorder %v289_v30, %v293_v34  ;;  %vm300_vm13 = vcmp.lt.s32.totalorder %v290_v31, %v294_v35  ;;  %vm302_vm14 = vcmp.lt.s32.totalorder %v291_v32, %v295_v36  ;;  %v297_v37 = vsel %vm296_vm11, %v288_v29, %v292_v33 }
  0x47   : > { %v299_v38 = vsel %vm298_vm12, %v289_v30, %v293_v34  ;;  %v301_v39 = vsel %vm300_vm13, %v290_v31, %v294_v35  ;;  %v303_v40 = vsel %vm302_vm14, %v291_v32, %v295_v36  ;;  %vm304_vm15 = vcmp.eq.s32.totalorder %v297_v37, 1 }
  0x48   : > { %vm305_vm0 = vcmp.eq.s32.totalorder %v299_v38, 1  ;;  %vm306_vm1 = vcmp.eq.s32.totalorder %v301_v39, 1  ;;  %vm307_vm2 = vcmp.eq.s32.totalorder %v303_v40, 1  ;;  %v308_v41 = vsel %vm304_vm15, 4294967295, %v297_v37 }
  0x49   : > { %v309_v42 = vsel %vm305_vm0, 4294967295, %v299_v38  ;;  %v310_v43 = vsel %vm306_vm1, 4294967295, %v301_v39  ;;  %v311_v44 = vsel %vm307_vm2, 4294967295, %v303_v40  ;;  %vm312_vm3 = vcmp.eq.s32.totalorder %v297_v37, 0 }
  0x4a   : > { %vm313_vm4 = vcmp.eq.s32.totalorder %v299_v38, 0  ;;  %vm314_vm5 = vcmp.eq.s32.totalorder %v301_v39, 0  ;;  %vm315_vm6 = vcmp.eq.s32.totalorder %v303_v40, 0  ;;  %v1019_v45 = vsel %vm312_vm3, 1, %v308_v41 }
  0x4b   : > { %v1021_v46 = vsel %vm313_vm4, 1, %v309_v42  ;;  %v1023_v47 = vsel %vm314_vm5, 1, %v310_v43  ;;  %v1025_v48 = vsel %vm315_vm6, 1, %v311_v44  ;;  %v320_v49 = vcvt.s32.f32 %v1019_v45 }
  0x4c   : > { %v321_v50 = vcvt.s32.f32 %v1021_v46  ;;  %v322_v51 = vcvt.s32.f32 %v1023_v47  ;;  %v323_v52 = vcvt.s32.f32 %v1025_v48  ;;  %vm328_vm7 = vcmp.eq.s32.totalorder %v1019_v45, 1 }
  0x4d   : > { %vm329_vm8 = vcmp.eq.s32.totalorder %v1021_v46, 1  ;;  %vm330_vm11 = vcmp.eq.s32.totalorder %v1023_v47, 1  ;;  %vm331_vm12 = vcmp.eq.s32.totalorder %v1025_v48, 1  ;;  %v606_v53 = vsel %vm328_vm7, 1.0, %v851_v26 }
  0x4e   : > { %v607_v54 = vsel %vm329_vm8, 1.0, %v851_v26  ;;  %v608_v55 = vsel %vm330_vm11, 1.0, %v851_v26  ;;  %v609_v56 = vsel %vm331_vm12, 1.0, %v851_v26  ;;  %vm416_vm13 = vcmp.lt.s32.totalorder %v1004_v25, 256 }
  0x4f   : > { %v1043_v57 = vsel %vm414_vm9, 1.0, %v851_v26  ;;  %v1048_v58 = vsel %vm415_vm10, 1.0, %v851_v26  ;;  %v425_v59 = vmul.f32 %v1007_v27, %v606_v53  ;;  %v1052_v60 = vsel %vm416_vm13, 1.0, %v851_v26 }
  0x50   : > { %v426_v61 = vmul.f32 %v1043_v57, %v607_v54  ;;  %v427_v62 = vmul.f32 %v1048_v58, %v608_v55  ;;  %vm340_vm14 = vcmp.eq.s32.totalorder %v1019_v45, 4294967295  ;;  %v428_v1 = vmul.f32 %v1052_v60, %v609_v56 }
  0x51   : > { %vm341_vm9 = vcmp.eq.s32.totalorder %v1021_v46, 4294967295  ;;  %vm342_vm10 = vcmp.eq.s32.totalorder %v1023_v47, 4294967295  ;;  %vm343_vm15 = vcmp.eq.s32.totalorder %v1025_v48, 4294967295  ;;  %v610_v6 = vsel %vm340_vm14, 1.0, %v851_v26 }
  0x52   : > { %v442_v5 = vadd.f32 %v426_v61, %v425_v59  ;;  %v611_v7 = vsel %vm341_vm9, 1.0, %v851_v26  ;;  %v612_v8 = vsel %vm342_vm10, 1.0, %v851_v26  ;;  %v613_v12 = vsel %vm343_vm15, 1.0, %v851_v26 }
  0x53   : > { %v429_v13 = vmul.f32 %v1007_v27, %v610_v6  ;;  %v430_v14 = vmul.f32 %v1043_v57, %v611_v7  ;;  %v431_v15 = vmul.f32 %v1048_v58, %v612_v8  ;;  %v432_v17 = vmul.f32 %v1052_v60, %v613_v12 }
  0x54   : > { %v443_v16 = vadd.f32 %v442_v5, %v427_v62  ;;  %v248_v18 = vmax.f32 %v232_v63, %v236_v3  ;;  %v249_v19 = vmax.f32 %v233_v0, %v237_v4  ;;  %v250_v21 = vmax.f32 %v234_v2, %v238_v10 }
  0x55   : > { %v449_v20 = vadd.f32 %v430_v14, %v429_v13  ;;  %v251_v22 = vmax.f32 %v235_v9, %v239_v11  ;;  %v352_v23 = vadd.f32 1.0, %v320_v49  ;;  %v353_v53 = vadd.f32 1.0, %v321_v50 }
  0x56   : > { %v444_v24 = vadd.f32 %v443_v16, %v428_v1  ;;  %vm252_vm0 = vcmp.eq.f32.partialorder %v232_v63, %v248_v18  ;;  %vm253_vm1 = vcmp.eq.f32.partialorder %v233_v0, %v249_v19  ;;  %vm256_vm2 = vcmp.eq.f32.partialorder %v236_v3, %v248_v18 }
  0x57   : > { %v450_v25 = vadd.f32 %v449_v20, %v431_v15  ;;  %vm254_vm3 = vcmp.eq.f32.partialorder %v234_v2, %v250_v21  ;;  %vm255_vm4 = vcmp.eq.f32.partialorder %v235_v9, %v251_v22  ;;  %vm257_vm5 = vcmp.eq.f32.partialorder %v237_v4, %v249_v19 }
  0x58   : > { %vm258_vm6 = vcmp.eq.f32.partialorder %v238_v10, %v250_v21  ;;  %vm259_vm7 = vcmp.eq.f32.partialorder %v239_v11, %v251_v22  ;;  %v260_v26 = vsel %vm252_vm0, 0, %v852_v28  ;;  %v261_v30 = vsel %vm253_vm1, 0, %v852_v28  ;;  %446 = vst [vmem:[%s1084_s19] sm:$0xff] %v444_v24 }
  0x59   : > { %v451_v29 = vadd.f32 %v450_v25, %v432_v17  ;;  %v262_v31 = vsel %vm254_vm3, 0, %v852_v28  ;;  %v263_v32 = vsel %vm255_vm4, 0, %v852_v28  ;;  %v264_v33 = vsel %vm256_vm2, 1, %v852_v28 }
  0x5a   : > { %v265_v34 = vsel %vm257_vm5, 1, %v852_v28  ;;  %v266_v35 = vsel %vm258_vm6, 1, %v852_v28  ;;  %v267_v36 = vsel %vm259_vm7, 1, %v852_v28  ;;  %vm268_vm8 = vcmp.lt.s32.totalorder %v260_v26, %v264_v33 }
  0x5b   : > { %vm270_vm11 = vcmp.lt.s32.totalorder %v261_v30, %v265_v34  ;;  %vm272_vm12 = vcmp.lt.s32.totalorder %v262_v31, %v266_v35  ;;  %v269_v37 = vsel %vm268_vm8, %v260_v26, %v264_v33  ;;  %vm274_vm13 = vcmp.lt.s32.totalorder %v263_v32, %v267_v36  ;;  %619 = vst [vmem:[%s1084_s19 + $0x8] sm:$0xff] %v451_v29 }
  0x5c   : > { %v271_v38 = vsel %vm270_vm11, %v261_v30, %v265_v34  ;;  %v273_v39 = vsel %vm272_vm12, %v262_v31, %v266_v35  ;;  %v275_v40 = vsel %vm274_vm13, %v263_v32, %v267_v36  ;;  %v324_v41 = vcvt.s32.f32 %v269_v37 }
  0x5d   : > { %v325_v42 = vcvt.s32.f32 %v271_v38  ;;  %v326_v43 = vcvt.s32.f32 %v273_v39  ;;  %v327_v44 = vcvt.s32.f32 %v275_v40  ;;  %v354_v54 = vadd.f32 1.0, %v322_v51 }
  0x5e   : > { %v355_v28 = vadd.f32 1.0, %v323_v52  ;;  %v356_v55 = vmul.f32 0.5, %v352_v23  ;;  %v368_v56 = vsub.f32 2.0, %v324_v41  ;;  %v357_v62 = vmul.f32 0.5, %v353_v53 }
  0x5f   : > { %v369_v59 = vsub.f32 2.0, %v325_v42  ;;  %v370_v61 = vsub.f32 2.0, %v326_v43  ;;  %v358_v63 = vmul.f32 0.5, %v354_v54  ;;  %v371_v1 = vsub.f32 2.0, %v327_v44 }
  0x60   : > { %v359_v0 = vmul.f32 0.5, %v355_v28  ;;  %v360_v2 = vmul.f32 %v356_v55, %v324_v41  ;;  %v372_v3 = vmax.f32 %v368_v56, 0.0  ;;  %v361_v6 = vmul.f32 %v357_v62, %v325_v42 }
  0x61   : > { %v373_v4 = vmax.f32 %v369_v59, 0.0  ;;  %v374_v5 = vmax.f32 %v370_v61, 0.0  ;;  %v362_v7 = vmul.f32 %v358_v63, %v326_v43  ;;  %v375_v9 = vmax.f32 %v371_v1, 0.0 }
  0x62   : > { %v363_v8 = vmul.f32 %v359_v0, %v327_v44  ;;  %v364_v10 = vmul.f32 %v360_v2, %v324_v41  ;;  %v376_v11 = vsub.f32 1.0, %v320_v49  ;;  %v377_v12 = vsub.f32 1.0, %v321_v50 }
  0x63   : > { %v378_v13 = vsub.f32 1.0, %v322_v51  ;;  %v365_v14 = vmul.f32 %v361_v6, %v325_v42  ;;  %v366_v15 = vmul.f32 %v362_v7, %v326_v43  ;;  %v379_v17 = vsub.f32 1.0, %v323_v52 }
  0x64   : > { %v367_v16 = vmul.f32 %v363_v8, %v327_v44  ;;  %v433_v18 = vmul.f32 %v1007_v27, %v364_v10  ;;  %v380_v19 = vmul.f32 0.5, %v376_v11  ;;  %v381_v20 = vmul.f32 0.5, %v377_v12 }
  0x65   : > { %v382_v21 = vmul.f32 0.5, %v378_v13  ;;  %v434_v45 = vmul.f32 %v1043_v57, %v365_v14  ;;  %v435_v49 = vmul.f32 %v1048_v58, %v366_v15  ;;  %v383_v46 = vmul.f32 0.5, %v379_v17 }
  0x66   : > { %v384_v50 = vmul.f32 %v380_v19, %v372_v3  ;;  %v385_v22 = vmul.f32 %v381_v20, %v373_v4  ;;  %v436_v51 = vmul.f32 %v1052_v60, %v367_v16 }
  0x67   : > { %v386_v47 = vmul.f32 %v382_v21, %v374_v5  ;;  %v456_v23 = vadd.f32 %v434_v45, %v433_v18  ;;  %v387_v48 = vmul.f32 %v383_v46, %v375_v9 }
  0x68   : > { %v388_v52 = vmul.f32 %v384_v50, %v372_v3  ;;  %v389_v24 = vmul.f32 %v385_v22, %v373_v4 }
  0x69   : > { %v390_v25 = vmul.f32 %v386_v47, %v374_v5  ;;  %v457_v26 = vadd.f32 %v456_v23, %v435_v49  ;;  %v391_v29 = vmul.f32 %v387_v48, %v375_v9 }
  0x6a   : > { %v437_v30 = vmul.f32 %v1007_v27, %v388_v52  ;;  %v438_v31 = vmul.f32 %v1043_v57, %v389_v24 }
  0x6b   : > { %v439_v32 = vmul.f32 %v1048_v58, %v390_v25  ;;  %v458_v33 = vadd.f32 %v457_v26, %v436_v51  ;;  %v440_v34 = vmul.f32 %v1052_v60, %v391_v29 }
  0x6c   : > { %v463_v35 = vadd.f32 %v438_v31, %v437_v30 }
  0x6d   : > { %621 = vst [vmem:[%s1084_s19 + $0x10] sm:$0xff] %v458_v33 }
  0x6e   : > { %v464_v36 = vadd.f32 %v463_v35, %v439_v32 }
  0x70   : > { %v465_v37 = vadd.f32 %v464_v36, %v440_v34 }
  0x72   : > { %623 = vst [vmem:[%s1084_s19 + $0x18] sm:$0xff] %v465_v37 }
  0x73   : > { %774 = shalt.err (!%p771_p7)
}
  0x74   : > { %s775_s27 = scalar_lea.hbm %s1120_s8, 512  ;;  %s779_s20 = scalar_lea.hbm %s1173_s2, 1024 }
  0x75   : > { %p776_p10 = scmp.ne.s32.totalorder %s1120_s8, %s775_s27  ;;  %p780_p3 = scmp.lt.s32.totalorder %s1120_s8, %s1173_s2 }
  0x76   : > { %p781_p8 = scmp.lt.s32.totalorder %s779_s20, %s775_s27 }
  0x77   : > { %p777_p1 = pnand %p776_p10, %p922_p9 }
  0x78   : > { %p782_p0 = por %p781_p8, %p780_p3 }
  0x79   : > { %p778_p13 = pneg %p777_p1 }
  0x7b   : > { %p783_p2 = pnand %p782_p0, %p778_p13 }
  0x7d   : > { %786 = shalt.err (!%p783_p2)
}
  0x7e   : > { %s854_s21 = smov 128   ;;  %s855_s19 = smov 8  }
  0x7f   : > { %636 = dma.vmem_to_hbm [thread:$0]  (%p922_p9), %s1122_s29, 512, %s1120_s8, %s469_s15, %s854_s21, %s854_s21, %s855_s19  }
  0x80 PF: > { %s497_s28 = sand.u32 1, %s825_s9   ;;  %p646_p5 = pnand %p595_p12, %p929_p11 }
  0x81   : > { %s498_s3 = scalar_lea.sflag [#allocation4], %s497_s28 }
  0x82   : > { %p647_p6 = pneg %p646_p5 }
  0x84   : > { %820 = dma.done.wait (%p647_p6), %s498_s3, 512  }
  0x85   : > { %822 = vsyncadd (%p647_p6), %s498_s3, 4294966784  ;;  %s21_s14 = sadd.s32 1, %s845_s14   ;;  %s1180_s9 = smov %s829_s10 }
  0x86   : > { %p18_p4 = scmp.ge.s32.totalorder %s21_s14, 4   ;;  %s1181_s10 = smov %s833_s11 }
  0x87   : > { %s1182_s11 = smov %s927_s23  ;;  %s1183_s12 = smov %s841_s13 }
  0x88   : > { %s1184_s13 = smov %s1186_s17  ;;  %20 = sbr.rel (!%p18_p4) target bundleno = 8 (0x8), region = 93 }
  0x8d   :  { %503 = vsyncpa [#allocation3], 1 }
  0x8e   :  { %505 = vsyncpa [#allocation3 + $0x1], 1 }
  0x8f   :  { %506 = vsyncpa [#allocation6], 1 }
  0x90   :  { %508 = vsyncpa [#allocation6 + $0x1], 1 }
  0x91   :  { %509 = vsyncpa [#allocation4], 1 }
  0x92   :  { %511 = vsyncpa [#allocation4 + $0x1], 1 }

</bundles_post_ra>
